<compile_context>
chip_gen: v7x
topology: tpu7x:2x2x1
jax: 0.10.0
libtpu: 0.0.40
codegen_flags: <defaults>
</compile_context>

<pallas_src>
import functools
import math

import jax
import jax.numpy as jnp
from jax import lax
from jax.experimental import pallas as pl
from jax.experimental.pallas import tpu as pltpu


_TARGET_BLOCK_BYTES = 2 * 1024 * 1024  # ~2 MiB blocks: >85% of HBM roofline


def _causal_mask_flat_kernel(x_ref, m_ref, o_ref):
    # x_ref/o_ref: (TB, n*n) lane-dense block; m_ref: (1, n*n) additive mask.
    o_ref[...] = x_ref[...] + m_ref[...]


def _causal_mask_tiled_kernel(x_ref, o_ref, *, tq):
    # x_ref/o_ref: (TB, tq, n) block of attention scores.
    x = x_ref[...]
    n_cols = x.shape[-1]
    q0 = pl.program_id(1) * tq
    # 2-D mask (tq, n), broadcast over the leading TB axis (cheap on vregs).
    row = q0 + lax.broadcasted_iota(jnp.int32, (tq, n_cols), 0)
    col = lax.broadcasted_iota(jnp.int32, (tq, n_cols), 1)
    add = jnp.where(col <= row,
                    jnp.zeros((), x.dtype),
                    jnp.full((), -jnp.inf, x.dtype))
    o_ref[...] = x + add


@functools.partial(jax.jit, static_argnames=("mask",))
def mask_forward(x, mask="none"):
    """Pallas equivalent of Mask(mask).forward(x). x: (..., N, N)."""
    if mask == "none":
        return x
    assert mask == "causal", f"unsupported mask mode: {mask}"
    assert jnp.issubdtype(x.dtype, jnp.floating), (
        "causal mask requires a floating-point score dtype")

    n = x.shape[-1]
    m = x.shape[-2]
    assert m == n, "causal mask expects square last two dims"
    lead = x.shape[:-2]
    bh = math.prod(lead) if lead else 1
    dtype_bytes = jnp.dtype(x.dtype).itemsize

    if n < 128:
        # ---- small-N path: lane-dense flatten + batched rows ----
        xf = x.reshape(bh, n * n)

        # Precompute the (1, n*n) additive mask once (tiny: n*n elements).
        lane = jnp.arange(n * n, dtype=jnp.int32)
        row = lane // n
        col = lane % n
        add_flat = jnp.where(col <= row, 0.0, -jnp.inf).astype(
            x.dtype).reshape(1, n * n)

        row_bytes = n * n * dtype_bytes
        tb = max(1, _TARGET_BLOCK_BYTES // row_bytes)
        if tb >= bh:
            tb = bh                      # full extent -> no sublane constraint
        else:
            tb = max(8, (tb // 8) * 8)   # keep second-last dim 8-aligned

        out = pl.pallas_call(
            _causal_mask_flat_kernel,
            out_shape=jax.ShapeDtypeStruct((bh, n * n), x.dtype),
            grid_spec=pltpu.PrefetchScalarGridSpec(
                num_scalar_prefetch=0,
                grid=(pl.cdiv(bh, tb),),
                in_specs=[
                    pl.BlockSpec((tb, n * n), lambda i: (i, 0)),
                    pl.BlockSpec((1, n * n), lambda i: (0, 0)),
                ],
                out_specs=pl.BlockSpec((tb, n * n), lambda i: (i, 0)),
            ),
            compiler_params=pltpu.CompilerParams(
                dimension_semantics=("parallel",)),
        )(xf, add_flat)
        return out.reshape(*lead, n, n)

    # ---- large-N path: tile over (batch, query) to respect VMEM budgets ----
    x3 = x.reshape(bh, n, n)
    row_bytes = n * dtype_bytes
    max_tq = _TARGET_BLOCK_BYTES // row_bytes
    if max_tq >= n:
        tq = n
    else:
        tq = None
        start = max(8, (min(max_tq, n) // 8) * 8)
        for cand in range(start, 0, -8):   # prefer a divisor of n
            if n % cand == 0:
                tq = cand
                break
        if tq is None:
            tq = start                     # uneven division: Pallas masks tail

    block_bytes = tq * n * dtype_bytes
    tb = min(bh, max(1, _TARGET_BLOCK_BYTES // block_bytes))

    out3 = pl.pallas_call(
        functools.partial(_causal_mask_tiled_kernel, tq=tq),
        out_shape=jax.ShapeDtypeStruct((bh, n, n), x.dtype),
        grid_spec=pltpu.PrefetchScalarGridSpec(
            num_scalar_prefetch=0,
            grid=(pl.cdiv(bh, tb), pl.cdiv(n, tq)),
            in_specs=[pl.BlockSpec((tb, tq, n), lambda i, j: (i, j, 0))],
            out_specs=pl.BlockSpec((tb, tq, n), lambda i, j: (i, j, 0)),
        ),
        compiler_params=pltpu.CompilerParams(
            dimension_semantics=("parallel", "parallel")),
    )(x3)
    return out3.reshape(*lead, n, n)


def _reference(x, mask="none"):
    if mask == "none":
        return x
    n = x.shape[-1]
    tril = jnp.tril(jnp.ones((n, n), dtype=x.dtype))
    return x + (1 - 1 / tril)


if __name__ == "__main__":
    key = jax.random.PRNGKey(0)
    k1, k2 = jax.random.split(key)

    # Small-N path (lane-dense flatten): matches the module's typical use.
    B, H, N = 2, 4, 16
    x = jax.random.normal(k1, (B, H, N, N), dtype=jnp.float32)
    out_causal = jax.block_until_ready(mask_forward(x, mask="causal"))
    ref_causal = _reference(x, mask="causal")
    assert out_causal.shape == x.shape
    assert out_causal.dtype == x.dtype
    assert jnp.array_equal(out_causal, ref_causal), "small-N causal mismatch"

    # Large-N path (query-tiled), bf16 to exercise dtype handling.
    x2 = jax.random.normal(k2, (2, 2, 128, 128), dtype=jnp.bfloat16)
    out2 = jax.block_until_ready(mask_forward(x2, mask="causal"))
    ref2 = _reference(x2, mask="causal")
    assert jnp.array_equal(out2, ref2), "large-N causal mismatch"

    # 'none' path is identity.
    out_none = jax.block_until_ready(mask_forward(x, mask="none"))
    assert jnp.array_equal(out_none, x)

    print("KERNEL_OK")
</pallas_src>

<mosaic_0001>
module attributes {stable_mosaic.version = 11 : i64} {
  func.func @_causal_mask_flat_kernel(%arg0: i32, %arg1: memref<8x256xf32, #tpu.memory_space<vmem>>, %arg2: memref<1x256xf32, #tpu.memory_space<vmem>>, %arg3: memref<8x256xf32, #tpu.memory_space<vmem>>) attributes {dimension_semantics = [#tpu.dimension_semantics<parallel>], iteration_bounds = array<i64: 1>, scalar_prefetch = 0 : i64, scratch_operands = 0 : i64, tpu.core_type = #tpu.core_type<tc>, window_params = [{transform_indices = @transform_0, window_bounds = array<i64: 8, 256>}, {pipeline_mode = #tpu.pipeline_mode<synchronous>, transform_indices = @transform_1, window_bounds = array<i64: 1, 256>}, {transform_indices = @transform_2, window_bounds = array<i64: 8, 256>}]} {
    %c0 = arith.constant 0 : index
    %c0_0 = arith.constant 0 : index
    %0 = vector.load %arg1[%c0, %c0_0] : memref<8x256xf32, #tpu.memory_space<vmem>>, vector<8x256xf32>
    %c0_1 = arith.constant 0 : index
    %c0_2 = arith.constant 0 : index
    %1 = vector.load %arg2[%c0_1, %c0_2] : memref<1x256xf32, #tpu.memory_space<vmem>>, vector<1x256xf32>
    %2 = vector.broadcast %1 : vector<1x256xf32> to vector<8x256xf32>
    %3 = arith.addf %0, %2 : vector<8x256xf32>
    %c0_3 = arith.constant 0 : index
    %c0_4 = arith.constant 0 : index
    %4 = vector.load %arg3[%c0_3, %c0_4] : memref<8x256xf32, #tpu.memory_space<vmem>>, vector<8x256xf32>
    tpu.vector_store %arg3[%c0_3, %c0_4], %3 {strides = array<i32>} : memref<8x256xf32, #tpu.memory_space<vmem>>, vector<8x256xf32>,
    return
  }
  func.func @transform_0(%arg0: i32) -> (i32, i32) {
    %c0_i32 = arith.constant 0 : i32
    %c0_i32_0 = arith.constant 0 : i32
    return %arg0, %c0_i32 : i32, i32
  }
  func.func @transform_1(%arg0: i32) -> (i32, i32) {
    %c0_i32 = arith.constant 0 : i32
    %c0_i32_0 = arith.constant 0 : i32
    %c0_i32_1 = arith.constant 0 : i32
    return %c0_i32, %c0_i32_0 : i32, i32
  }
  func.func @transform_2(%arg0: i32) -> (i32, i32) {
    %c0_i32 = arith.constant 0 : i32
    %c0_i32_0 = arith.constant 0 : i32
    return %arg0, %c0_i32 : i32, i32
  }
}

</mosaic_0001>

<bundles_post_ra>
// kernel: mask_forward.1
= control target key start
LH: loop header
LB: loop body
LE: loop exit
PB: predicated region body
PF: predicated region fallthrough
CT: control target
= control target key end

     0   :  { %v15_v0 = vlaneseq  ;;  %s63_s1 = inlined_call_operand.vmem [shape: f32[1,256], index: 1, kind: input, shape index: {}]   ;;  %s64_s0 = inlined_call_operand.vmem [shape: f32[8,256], index: 0, kind: input, shape index: {}]   ;;  %s65_s2 = inlined_call_operand.vmem [shape: f32[8,256], index: 2, kind: output, shape index: {}]  }
   0x1   :  { %v13_v2 = vld [vmem:[%s63_s1] sm:$0x3]  ;;  %v12_v6 = vld [vmem:[%s64_s0 + $0x8] sm:$0xff] }
   0x2   :  { %v16_v1 = vshrl.u32 %v15_v0, 7  ;;  %v11_v5 = vld [vmem:[%s64_s0] sm:$0xff] }
   0x4   :  { %v17_v3 = vsub.s32 0, %v16_v1  ;;  %v21_v4 = vsub.s32 1, %v16_v1 }
   0x6   :  { %v18_v7 = vrot.slane %v13_v2, %v17_v3  ;;  %v22_v8 = vrot.slane %v13_v2, %v21_v4 }
   0x8   :  { %v25_v9 = vadd.f32 %v18_v7, %v11_v5  ;;  %v26_v10 = vadd.f32 %v22_v8, %v12_v6 }
   0xa   :  { %27 = vst [vmem:[%s65_s2] sm:$0xff] %v25_v9  ;;  %28 = vst [vmem:[%s65_s2 + $0x8] sm:$0xff] %v26_v10 }

</bundles_post_ra>
